<compile_context>
chip_gen: v6e
topology: v6e:2x2x1
jax: 0.10.0
libtpu: 0.0.40
codegen_flags: <defaults>
</compile_context>

<pallas_src>
import numpy as np
import jax
import jax.numpy as jnp
from jax.experimental import pallas as pl
from jax.experimental.pallas import tpu as pltpu

BN_EPS = 1e-5


# ----------------------------- Pallas kernel -------------------------------
def _implicit_fused_kernel(pts_ref, shA_ref, shB_ref,
                           w1a_ref, w2a_ref, t2a_ref, w3a_ref, t3a_ref,
                           w4a_ref, b4a_ref,
                           w1b_ref, w2b_ref, t2b_ref, w3b_ref, t3b_ref,
                           w4b_ref, b4b_ref,
                           o_ref):
    """One (batch, point-tile): (3, tile_n) points -> unfold1 -> unfold2 -> (3, tile_n)."""
    f32, bf16 = jnp.float32, jnp.bfloat16

    def entry(w1, x3, shift):
        # K=3 contraction on the VPU as 3 broadcast multiply-adds (outer
        # products) instead of wasting an MXU pass; all f32.
        h = (w1[:, 0:1] * x3[0:1, :]
             + w1[:, 1:2] * x3[1:2, :]
             + w1[:, 2:3] * x3[2:3, :]
             + shift)
        return jnp.maximum(h, 0.0)

    def layer(w_ref, h, t_ref, relu=True):
        # bf16 operands -> native MXU pass; f32 accumulation; f32 bias / ReLU.
        o = jnp.dot(w_ref[...], h.astype(bf16),
                    preferred_element_type=f32) + t_ref[...]
        return jnp.maximum(o, 0.0) if relu else o

    x = pts_ref[0]                                      # (3, tile_n) f32

    # ---- unfold1: entry(VPU) -> 2x [MXU linear -> relu] -> MXU linear ----
    h = entry(w1a_ref[...], x, shA_ref[0])
    h = layer(w2a_ref, h, t2a_ref)
    h = layer(w3a_ref, h, t3a_ref)
    x1 = layer(w4a_ref, h, b4a_ref, relu=False)         # (3, tile_n)

    # ---- unfold2 on concat(x1, z); the z part is folded into shB ----
    h = entry(w1b_ref[...], x1, shB_ref[0])
    h = layer(w2b_ref, h, t2b_ref)
    h = layer(w3b_ref, h, t3b_ref)
    o_ref[0] = layer(w4b_ref, h, b4b_ref, relu=False)   # (3, tile_n) lane-dense


# ------------------------------- wrapper ------------------------------------
def implicit_fun_forward(z, points, fp1, fp2, *, max_tile_n=2048,
                         channels_last_output=True):
    """points: (B, N, 3); z: (z_dim,) or (B, z_dim). Returns (B, N, 3)
    (or (B, 3, N) lane-dense if channels_last_output=False)."""
    points = points.astype(jnp.float32)
    if z.ndim == 1:
        z = z[None, :]
    elif z.ndim == 3:
        # TODO(synk): per-point-varying z is not supported by the z-folding fast
        # path (z is assumed constant over the point axis); first point's z used.
        z = z[:, 0, :]
    z = z.astype(jnp.float32)

    B, N, _ = points.shape
    if z.shape[0] != B:
        z = jnp.broadcast_to(z, (B, z.shape[-1]))

    D1 = fp1["t1"].shape[0]
    # z folded into per-batch first-layer shift columns (tiny XLA matmuls).
    shA = (z @ fp1["w1z"] + fp1["t1"]).reshape(B, D1, 1)
    shB = (z @ fp2["w1z"] + fp2["t1"]).reshape(B, D1, 1)

    # Channels-on-sublanes / points-on-lanes layout for the whole network.
    pts_t = jnp.transpose(points, (0, 2, 1))            # (B, 3, N)

    # Point-axis tile (lane axis): must be a multiple of 128 unless it equals N.
    tile_n = min(N, max_tile_n)
    if tile_n < N:
        tile_n = max(128, (tile_n // 128) * 128)
    n_tiles = pl.cdiv(N, tile_n)
    # v7x has 2 TensorCores: ensure >= 2 parallel grid steps when possible.
    if B * n_tiles < 2 and tile_n >= 256:
        tile_n = (tile_n // 2 // 128) * 128
        n_tiles = pl.cdiv(N, tile_n)
    # NOTE: when N % tile_n != 0 the last tile reads padded rows; this is benign
    # because the network is strictly pointwise and OOB output writes are dropped.

    weights = (fp1["w1p"], fp1["w2"], fp1["t2"], fp1["w3"], fp1["t3"],
               fp1["w4"], fp1["b4"],
               fp2["w1p"], fp2["w2"], fp2["t2"], fp2["w3"], fp2["t3"],
               fp2["w4"], fp2["b4"])

    def _const_spec(a):
        # Small parameter, fully VMEM-resident; same block for every grid step.
        return pl.BlockSpec(a.shape, lambda b, i: (0,) * a.ndim)

    out_t = pl.pallas_call(
        _implicit_fused_kernel,
        out_shape=jax.ShapeDtypeStruct((B, 3, N), jnp.float32),
        grid_spec=pltpu.PrefetchScalarGridSpec(
            num_scalar_prefetch=0,
            grid=(B, n_tiles),
            in_specs=[pl.BlockSpec((1, 3, tile_n), lambda b, i: (b, 0, i)),
                      pl.BlockSpec((1, D1, 1), lambda b, i: (b, 0, 0)),
                      pl.BlockSpec((1, D1, 1), lambda b, i: (b, 0, 0))]
                     + [_const_spec(a) for a in weights],
            out_specs=pl.BlockSpec((1, 3, tile_n), lambda b, i: (b, 0, i)),
        ),
        compiler_params=pltpu.CompilerParams(
            dimension_semantics=("parallel", "parallel"),
            vmem_limit_bytes=32 * 1024 * 1024),
    )(pts_t, shA, shB, *weights)

    if channels_last_output:
        return jnp.transpose(out_t, (0, 2, 1))          # (B, N, 3) module semantics
    return out_t                                        # (B, 3, N), no extra HBM pass


# -------------------------- parameter construction --------------------------
def init_mlp_adj_raw(key, nlatent):
    """Raw params mirroring mlpAdj(nlatent): conv1..4 (+ bn1..3 running stats)."""
    dims = [nlatent, nlatent, nlatent // 2, nlatent // 4, 3]
    layers = []
    for li in range(4):
        key, kw, kb, kg, kbe, km, kv = jax.random.split(key, 7)
        fan_out, fan_in = dims[li + 1], dims[li]
        layer = {
            "W": 0.1 * jax.random.normal(kw, (fan_out, fan_in), jnp.float32),
            "b": 0.1 * jax.random.normal(kb, (fan_out,), jnp.float32),
        }
        if li < 3:
            layer.update(
                gamma=1.0 + 0.1 * jax.random.normal(kg, (fan_out,), jnp.float32),
                beta=0.1 * jax.random.normal(kbe, (fan_out,), jnp.float32),
                mean=0.05 * jax.random.normal(km, (fan_out,), jnp.float32),
                var=1.0 + 0.1 * jax.random.uniform(kv, (fan_out,), jnp.float32),
            )
        layers.append(layer)
    return layers


def fold_mlp_params(raw):
    """Fold eval-mode BN into (D_out, D_in) weights / (D_out, 1) bias columns.

    MXU weights are stored bf16; the 3-wide entry weight stays f32 (VPU path);
    all biases/shifts stay f32.
    """
    bf16 = jnp.bfloat16

    def bn_fold(L):
        s = L["gamma"] / jnp.sqrt(L["var"] + BN_EPS)
        W = L["W"] * s[:, None]                     # (out, in) row-scaled
        t = (L["b"] - L["mean"]) * s + L["beta"]    # (out,)
        return W, t

    L1, L2, L3, L4 = raw
    W1, t1 = bn_fold(L1)
    W2, t2 = bn_fold(L2)
    W3, t3 = bn_fold(L3)
    return {
        "w1p": W1[:, :3],                           # (D1, 3) f32, VPU entry layer
        "w1z": W1[:, 3:].T,                         # (z_dim, D1) f32, folded in wrapper
        "t1": t1,                                   # (D1,)
        "w2": W2.astype(bf16), "t2": t2.reshape(-1, 1),
        "w3": W3.astype(bf16), "t3": t3.reshape(-1, 1),
        "w4": L4["W"].astype(bf16),                 # (3, D3)
        "b4": L4["b"].reshape(-1, 1),               # (3, 1)
    }


# ------------------------------ pure-JAX reference --------------------------
def _mlp_adj_ref(x2d, raw):
    h = x2d
    for li, L in enumerate(raw):
        h = h @ L["W"].T + L["b"]
        if li < 3:
            s = L["gamma"] / jnp.sqrt(L["var"] + BN_EPS)
            h = jnp.maximum((h - L["mean"]) * s + L["beta"], 0.0)
    return h


def _implicit_fun_ref(z, points, raw1, raw2):
    B, N, _ = points.shape
    z_exp = jnp.broadcast_to(z[:, None, :], (B, N, z.shape[-1])).astype(jnp.float32)
    pointz = jnp.concatenate([points.astype(jnp.float32), z_exp], axis=2)
    x1 = _mlp_adj_ref(pointz.reshape(B * N, -1), raw1).reshape(B, N, 3)
    x2 = jnp.concatenate([x1, z_exp], axis=2)
    return _mlp_adj_ref(x2.reshape(B * N, -1), raw2).reshape(B, N, 3)


# ----------------------------------- main -----------------------------------
if __name__ == "__main__":
    z_dim, add_dim = 32, 3            # module default is z_dim=256; small demo
    B, N = 2, 256
    nlatent = z_dim + add_dim         # 35; ImplicitFun uses z_dim+3 for both nets

    key = jax.random.PRNGKey(0)
    k_pts, k_z, k_p1, k_p2 = jax.random.split(key, 4)

    points = jax.random.normal(k_pts, (B, N, add_dim), jnp.float32)
    z = jax.random.normal(k_z, (B, z_dim), jnp.float32)

    raw1 = init_mlp_adj_raw(k_p1, nlatent)                 # unfold1
    raw2 = init_mlp_adj_raw(k_p2, nlatent)                 # unfold2
    fp1 = fold_mlp_params(raw1)
    fp2 = fold_mlp_params(raw2)

    out = implicit_fun_forward(z, points, fp1, fp2)
    out = jax.block_until_ready(out)

    ref = _implicit_fun_ref(z, points, raw1, raw2)
    # bf16 matmul operands with f32 accumulation vs f32 reference.
    np.testing.assert_allclose(np.asarray(out), np.asarray(ref),
                               rtol=1e-2, atol=1e-2)
    assert out.shape == (B, N, 3)

    print("KERNEL_OK")
</pallas_src>

<mosaic_0001>
module attributes {stable_mosaic.version = 11 : i64} {
  func.func @_implicit_fused_kernel(%arg0: i32, %arg1: i32, %arg2: memref<1x3x256xf32, #tpu.memory_space<vmem>>, %arg3: memref<1x35x1xf32, #tpu.memory_space<vmem>>, %arg4: memref<1x35x1xf32, #tpu.memory_space<vmem>>, %arg5: memref<35x3xf32, #tpu.memory_space<vmem>>, %arg6: memref<17x35xbf16, #tpu.memory_space<vmem>>, %arg7: memref<17x1xf32, #tpu.memory_space<vmem>>, %arg8: memref<8x17xbf16, #tpu.memory_space<vmem>>, %arg9: memref<8x1xf32, #tpu.memory_space<vmem>>, %arg10: memref<3x8xbf16, #tpu.memory_space<vmem>>, %arg11: memref<3x1xf32, #tpu.memory_space<vmem>>, %arg12: memref<35x3xf32, #tpu.memory_space<vmem>>, %arg13: memref<17x35xbf16, #tpu.memory_space<vmem>>, %arg14: memref<17x1xf32, #tpu.memory_space<vmem>>, %arg15: memref<8x17xbf16, #tpu.memory_space<vmem>>, %arg16: memref<8x1xf32, #tpu.memory_space<vmem>>, %arg17: memref<3x8xbf16, #tpu.memory_space<vmem>>, %arg18: memref<3x1xf32, #tpu.memory_space<vmem>>, %arg19: memref<1x3x256xf32, #tpu.memory_space<vmem>>) attributes {dimension_semantics = [#tpu.dimension_semantics<parallel>, #tpu.dimension_semantics<parallel>], iteration_bounds = array<i64: 2, 1>, scalar_prefetch = 0 : i64, scratch_operands = 0 : i64, tpu.core_type = #tpu.core_type<tc>, window_params = [{transform_indices = @transform_0, window_bounds = array<i64: 1, 3, 256>}, {transform_indices = @transform_1, window_bounds = array<i64: 1, 35, 1>}, {transform_indices = @transform_2, window_bounds = array<i64: 1, 35, 1>}, {pipeline_mode = #tpu.pipeline_mode<synchronous>, transform_indices = @transform_3, window_bounds = array<i64: 35, 3>}, {pipeline_mode = #tpu.pipeline_mode<synchronous>, transform_indices = @transform_4, window_bounds = array<i64: 17, 35>}, {pipeline_mode = #tpu.pipeline_mode<synchronous>, transform_indices = @transform_5, window_bounds = array<i64: 17, 1>}, {pipeline_mode = #tpu.pipeline_mode<synchronous>, transform_indices = @transform_6, window_bounds = array<i64: 8, 17>}, {pipeline_mode = #tpu.pipeline_mode<synchronous>, transform_indices = @transform_7, window_bounds = array<i64: 8, 1>}, {pipeline_mode = #tpu.pipeline_mode<synchronous>, transform_indices = @transform_8, window_bounds = array<i64: 3, 8>}, {pipeline_mode = #tpu.pipeline_mode<synchronous>, transform_indices = @transform_9, window_bounds = array<i64: 3, 1>}, {pipeline_mode = #tpu.pipeline_mode<synchronous>, transform_indices = @transform_10, window_bounds = array<i64: 35, 3>}, {pipeline_mode = #tpu.pipeline_mode<synchronous>, transform_indices = @transform_11, window_bounds = array<i64: 17, 35>}, {pipeline_mode = #tpu.pipeline_mode<synchronous>, transform_indices = @transform_12, window_bounds = array<i64: 17, 1>}, {pipeline_mode = #tpu.pipeline_mode<synchronous>, transform_indices = @transform_13, window_bounds = array<i64: 8, 17>}, {pipeline_mode = #tpu.pipeline_mode<synchronous>, transform_indices = @transform_14, window_bounds = array<i64: 8, 1>}, {pipeline_mode = #tpu.pipeline_mode<synchronous>, transform_indices = @transform_15, window_bounds = array<i64: 3, 8>}, {pipeline_mode = #tpu.pipeline_mode<synchronous>, transform_indices = @transform_16, window_bounds = array<i64: 3, 1>}, {transform_indices = @transform_17, window_bounds = array<i64: 1, 3, 256>}]} {
    %c0 = arith.constant 0 : index
    %c0_0 = arith.constant 0 : index
    %c0_1 = arith.constant 0 : index
    %0 = vector.load %arg2[%c0, %c0_0, %c0_1] : memref<1x3x256xf32, #tpu.memory_space<vmem>>, vector<1x3x256xf32>
    %1 = vector.shape_cast %0 : vector<1x3x256xf32> to vector<3x256xf32>
    %c0_2 = arith.constant 0 : index
    %c0_3 = arith.constant 0 : index
    %2 = vector.load %arg5[%c0_2, %c0_3] : memref<35x3xf32, #tpu.memory_space<vmem>>, vector<35x3xf32>
    %c0_4 = arith.constant 0 : index
    %c0_5 = arith.constant 0 : index
    %c0_6 = arith.constant 0 : index
    %3 = vector.load %arg3[%c0_4, %c0_5, %c0_6] : memref<1x35x1xf32, #tpu.memory_space<vmem>>, vector<1x35x1xf32>
    %4 = vector.shape_cast %3 : vector<1x35x1xf32> to vector<35x1xf32>
    %5 = vector.extract_strided_slice %2 {offsets = [0, 0], sizes = [35, 1], strides = [1, 1]} : vector<35x3xf32> to vector<35x1xf32>
    %6 = vector.extract_strided_slice %1 {offsets = [0, 0], sizes = [1, 256], strides = [1, 1]} : vector<3x256xf32> to vector<1x256xf32>
    %7 = vector.broadcast %5 : vector<35x1xf32> to vector<35x256xf32>
    %8 = vector.broadcast %6 : vector<1x256xf32> to vector<35x256xf32>
    %9 = arith.mulf %7, %8 : vector<35x256xf32>
    %10 = vector.extract_strided_slice %2 {offsets = [0, 1], sizes = [35, 1], strides = [1, 1]} : vector<35x3xf32> to vector<35x1xf32>
    %11 = vector.extract_strided_slice %1 {offsets = [1, 0], sizes = [1, 256], strides = [1, 1]} : vector<3x256xf32> to vector<1x256xf32>
    %12 = vector.broadcast %10 : vector<35x1xf32> to vector<35x256xf32>
    %13 = vector.broadcast %11 : vector<1x256xf32> to vector<35x256xf32>
    %14 = arith.mulf %12, %13 : vector<35x256xf32>
    %15 = arith.addf %9, %14 : vector<35x256xf32>
    %16 = vector.extract_strided_slice %2 {offsets = [0, 2], sizes = [35, 1], strides = [1, 1]} : vector<35x3xf32> to vector<35x1xf32>
    %17 = vector.extract_strided_slice %1 {offsets = [2, 0], sizes = [1, 256], strides = [1, 1]} : vector<3x256xf32> to vector<1x256xf32>
    %18 = vector.broadcast %16 : vector<35x1xf32> to vector<35x256xf32>
    %19 = vector.broadcast %17 : vector<1x256xf32> to vector<35x256xf32>
    %20 = arith.mulf %18, %19 : vector<35x256xf32>
    %21 = arith.addf %15, %20 : vector<35x256xf32>
    %22 = vector.broadcast %4 : vector<35x1xf32> to vector<35x256xf32>
    %23 = arith.addf %21, %22 : vector<35x256xf32>
    %cst = arith.constant 0.000000e+00 : f32
    %24 = vector.broadcast %cst : f32 to vector<35x256xf32>
    %25 = arith.maximumf %23, %24 : vector<35x256xf32>
    %c0_7 = arith.constant 0 : index
    %c0_8 = arith.constant 0 : index
    %26 = vector.load %arg6[%c0_7, %c0_8] : memref<17x35xbf16, #tpu.memory_space<vmem>>, vector<17x35xbf16>
    %27 = arith.truncf %25 : vector<35x256xf32> to vector<35x256xbf16>
    %cst_9 = arith.constant dense<0.000000e+00> : vector<17x256xf32>
    %28 = tpu.matmul %26, %27, %cst_9 {dimension_numbers = #tpu.dot_dimension_numbers<[1], [0], [0], [1], [0, 0, 1, 1], [], []>} : vector<17x35xbf16>, vector<35x256xbf16>, vector<17x256xf32> -> vector<17x256xf32>
    %c0_10 = arith.constant 0 : index
    %c0_11 = arith.constant 0 : index
    %29 = vector.load %arg7[%c0_10, %c0_11] : memref<17x1xf32, #tpu.memory_space<vmem>>, vector<17x1xf32>
    %30 = vector.broadcast %29 : vector<17x1xf32> to vector<17x256xf32>
    %31 = arith.addf %28, %30 : vector<17x256xf32>
    %cst_12 = arith.constant 0.000000e+00 : f32
    %32 = vector.broadcast %cst_12 : f32 to vector<17x256xf32>
    %33 = arith.maximumf %31, %32 : vector<17x256xf32>
    %c0_13 = arith.constant 0 : index
    %c0_14 = arith.constant 0 : index
    %34 = vector.load %arg8[%c0_13, %c0_14] : memref<8x17xbf16, #tpu.memory_space<vmem>>, vector<8x17xbf16>
    %35 = arith.truncf %33 : vector<17x256xf32> to vector<17x256xbf16>
    %cst_15 = arith.constant dense<0.000000e+00> : vector<8x256xf32>
    %36 = tpu.matmul %34, %35, %cst_15 {dimension_numbers = #tpu.dot_dimension_numbers<[1], [0], [0], [1], [0, 0, 1, 1], [], []>} : vector<8x17xbf16>, vector<17x256xbf16>, vector<8x256xf32> -> vector<8x256xf32>
    %c0_16 = arith.constant 0 : index
    %c0_17 = arith.constant 0 : index
    %37 = vector.load %arg9[%c0_16, %c0_17] : memref<8x1xf32, #tpu.memory_space<vmem>>, vector<8x1xf32>
    %38 = vector.broadcast %37 : vector<8x1xf32> to vector<8x256xf32>
    %39 = arith.addf %36, %38 : vector<8x256xf32>
    %cst_18 = arith.constant 0.000000e+00 : f32
    %40 = vector.broadcast %cst_18 : f32 to vector<8x256xf32>
    %41 = arith.maximumf %39, %40 : vector<8x256xf32>
    %c0_19 = arith.constant 0 : index
    %c0_20 = arith.constant 0 : index
    %42 = vector.load %arg10[%c0_19, %c0_20] : memref<3x8xbf16, #tpu.memory_space<vmem>>, vector<3x8xbf16>
    %43 = arith.truncf %41 : vector<8x256xf32> to vector<8x256xbf16>
    %cst_21 = arith.constant dense<0.000000e+00> : vector<3x256xf32>
    %44 = tpu.matmul %42, %43, %cst_21 {dimension_numbers = #tpu.dot_dimension_numbers<[1], [0], [0], [1], [0, 0, 1, 1], [], []>} : vector<3x8xbf16>, vector<8x256xbf16>, vector<3x256xf32> -> vector<3x256xf32>
    %c0_22 = arith.constant 0 : index
    %c0_23 = arith.constant 0 : index
    %45 = vector.load %arg11[%c0_22, %c0_23] : memref<3x1xf32, #tpu.memory_space<vmem>>, vector<3x1xf32>
    %46 = vector.broadcast %45 : vector<3x1xf32> to vector<3x256xf32>
    %47 = arith.addf %44, %46 : vector<3x256xf32>
    %c0_24 = arith.constant 0 : index
    %c0_25 = arith.constant 0 : index
    %48 = vector.load %arg12[%c0_24, %c0_25] : memref<35x3xf32, #tpu.memory_space<vmem>>, vector<35x3xf32>
    %c0_26 = arith.constant 0 : index
    %c0_27 = arith.constant 0 : index
    %c0_28 = arith.constant 0 : index
    %49 = vector.load %arg4[%c0_26, %c0_27, %c0_28] : memref<1x35x1xf32, #tpu.memory_space<vmem>>, vector<1x35x1xf32>
    %50 = vector.shape_cast %49 : vector<1x35x1xf32> to vector<35x1xf32>
    %51 = vector.extract_strided_slice %48 {offsets = [0, 0], sizes = [35, 1], strides = [1, 1]} : vector<35x3xf32> to vector<35x1xf32>
    %52 = vector.extract_strided_slice %47 {offsets = [0, 0], sizes = [1, 256], strides = [1, 1]} : vector<3x256xf32> to vector<1x256xf32>
    %53 = vector.broadcast %51 : vector<35x1xf32> to vector<35x256xf32>
    %54 = vector.broadcast %52 : vector<1x256xf32> to vector<35x256xf32>
    %55 = arith.mulf %53, %54 : vector<35x256xf32>
    %56 = vector.extract_strided_slice %48 {offsets = [0, 1], sizes = [35, 1], strides = [1, 1]} : vector<35x3xf32> to vector<35x1xf32>
    %57 = vector.extract_strided_slice %47 {offsets = [1, 0], sizes = [1, 256], strides = [1, 1]} : vector<3x256xf32> to vector<1x256xf32>
    %58 = vector.broadcast %56 : vector<35x1xf32> to vector<35x256xf32>
    %59 = vector.broadcast %57 : vector<1x256xf32> to vector<35x256xf32>
    %60 = arith.mulf %58, %59 : vector<35x256xf32>
    %61 = arith.addf %55, %60 : vector<35x256xf32>
    %62 = vector.extract_strided_slice %48 {offsets = [0, 2], sizes = [35, 1], strides = [1, 1]} : vector<35x3xf32> to vector<35x1xf32>
    %63 = vector.extract_strided_slice %47 {offsets = [2, 0], sizes = [1, 256], strides = [1, 1]} : vector<3x256xf32> to vector<1x256xf32>
    %64 = vector.broadcast %62 : vector<35x1xf32> to vector<35x256xf32>
    %65 = vector.broadcast %63 : vector<1x256xf32> to vector<35x256xf32>
    %66 = arith.mulf %64, %65 : vector<35x256xf32>
    %67 = arith.addf %61, %66 : vector<35x256xf32>
    %68 = vector.broadcast %50 : vector<35x1xf32> to vector<35x256xf32>
    %69 = arith.addf %67, %68 : vector<35x256xf32>
    %cst_29 = arith.constant 0.000000e+00 : f32
    %70 = vector.broadcast %cst_29 : f32 to vector<35x256xf32>
    %71 = arith.maximumf %69, %70 : vector<35x256xf32>
    %c0_30 = arith.constant 0 : index
    %c0_31 = arith.constant 0 : index
    %72 = vector.load %arg13[%c0_30, %c0_31] : memref<17x35xbf16, #tpu.memory_space<vmem>>, vector<17x35xbf16>
    %73 = arith.truncf %71 : vector<35x256xf32> to vector<35x256xbf16>
    %cst_32 = arith.constant dense<0.000000e+00> : vector<17x256xf32>
    %74 = tpu.matmul %72, %73, %cst_32 {dimension_numbers = #tpu.dot_dimension_numbers<[1], [0], [0], [1], [0, 0, 1, 1], [], []>} : vector<17x35xbf16>, vector<35x256xbf16>, vector<17x256xf32> -> vector<17x256xf32>
    %c0_33 = arith.constant 0 : index
    %c0_34 = arith.constant 0 : index
    %75 = vector.load %arg14[%c0_33, %c0_34] : memref<17x1xf32, #tpu.memory_space<vmem>>, vector<17x1xf32>
    %76 = vector.broadcast %75 : vector<17x1xf32> to vector<17x256xf32>
    %77 = arith.addf %74, %76 : vector<17x256xf32>
    %cst_35 = arith.constant 0.000000e+00 : f32
    %78 = vector.broadcast %cst_35 : f32 to vector<17x256xf32>
    %79 = arith.maximumf %77, %78 : vector<17x256xf32>
    %c0_36 = arith.constant 0 : index
    %c0_37 = arith.constant 0 : index
    %80 = vector.load %arg15[%c0_36, %c0_37] : memref<8x17xbf16, #tpu.memory_space<vmem>>, vector<8x17xbf16>
    %81 = arith.truncf %79 : vector<17x256xf32> to vector<17x256xbf16>
    %cst_38 = arith.constant dense<0.000000e+00> : vector<8x256xf32>
    %82 = tpu.matmul %80, %81, %cst_38 {dimension_numbers = #tpu.dot_dimension_numbers<[1], [0], [0], [1], [0, 0, 1, 1], [], []>} : vector<8x17xbf16>, vector<17x256xbf16>, vector<8x256xf32> -> vector<8x256xf32>
    %c0_39 = arith.constant 0 : index
    %c0_40 = arith.constant 0 : index
    %83 = vector.load %arg16[%c0_39, %c0_40] : memref<8x1xf32, #tpu.memory_space<vmem>>, vector<8x1xf32>
    %84 = vector.broadcast %83 : vector<8x1xf32> to vector<8x256xf32>
    %85 = arith.addf %82, %84 : vector<8x256xf32>
    %cst_41 = arith.constant 0.000000e+00 : f32
    %86 = vector.broadcast %cst_41 : f32 to vector<8x256xf32>
    %87 = arith.maximumf %85, %86 : vector<8x256xf32>
    %c0_42 = arith.constant 0 : index
    %c0_43 = arith.constant 0 : index
    %88 = vector.load %arg17[%c0_42, %c0_43] : memref<3x8xbf16, #tpu.memory_space<vmem>>, vector<3x8xbf16>
    %89 = arith.truncf %87 : vector<8x256xf32> to vector<8x256xbf16>
    %cst_44 = arith.constant dense<0.000000e+00> : vector<3x256xf32>
    %90 = tpu.matmul %88, %89, %cst_44 {dimension_numbers = #tpu.dot_dimension_numbers<[1], [0], [0], [1], [0, 0, 1, 1], [], []>} : vector<3x8xbf16>, vector<8x256xbf16>, vector<3x256xf32> -> vector<3x256xf32>
    %c0_45 = arith.constant 0 : index
    %c0_46 = arith.constant 0 : index
    %91 = vector.load %arg18[%c0_45, %c0_46] : memref<3x1xf32, #tpu.memory_space<vmem>>, vector<3x1xf32>
    %92 = vector.broadcast %91 : vector<3x1xf32> to vector<3x256xf32>
    %93 = arith.addf %90, %92 : vector<3x256xf32>
    %c0_47 = arith.constant 0 : index
    %c0_48 = arith.constant 0 : index
    %c0_49 = arith.constant 0 : index
    %94 = vector.load %arg19[%c0_47, %c0_48, %c0_49] : memref<1x3x256xf32, #tpu.memory_space<vmem>>, vector<1x3x256xf32>
    %95 = vector.shape_cast %94 : vector<1x3x256xf32> to vector<3x256xf32>
    %96 = vector.shape_cast %93 : vector<3x256xf32> to vector<1x3x256xf32>
    tpu.vector_store %arg19[%c0_47, %c0_48, %c0_49], %96 {strides = array<i32>} : memref<1x3x256xf32, #tpu.memory_space<vmem>>, vector<1x3x256xf32>,
    return
  }
  func.func @transform_0(%arg0: i32, %arg1: i32) -> (i32, i32, i32) {
    %c0_i32 = arith.constant 0 : i32
    %c0_i32_0 = arith.constant 0 : i32
    return %arg0, %c0_i32, %arg1 : i32, i32, i32
  }
  func.func @transform_1(%arg0: i32, %arg1: i32) -> (i32, i32, i32) {
    %c0_i32 = arith.constant 0 : i32
    %c0_i32_0 = arith.constant 0 : i32
    %c0_i32_1 = arith.constant 0 : i32
    return %arg0, %c0_i32, %c0_i32_0 : i32, i32, i32
  }
  func.func @transform_2(%arg0: i32, %arg1: i32) -> (i32, i32, i32) {
    %c0_i32 = arith.constant 0 : i32
    %c0_i32_0 = arith.constant 0 : i32
    %c0_i32_1 = arith.constant 0 : i32
    return %arg0, %c0_i32, %c0_i32_0 : i32, i32, i32
  }
  func.func @transform_3(%arg0: i32, %arg1: i32) -> (i32, i32) {
    %c0_i32 = arith.constant 0 : i32
    %c0_i32_0 = arith.constant 0 : i32
    %c0_i32_1 = arith.constant 0 : i32
    return %c0_i32, %c0_i32_0 : i32, i32
  }
  func.func @transform_4(%arg0: i32, %arg1: i32) -> (i32, i32) {
    %c0_i32 = arith.constant 0 : i32
    %c0_i32_0 = arith.constant 0 : i32
    %c0_i32_1 = arith.constant 0 : i32
    return %c0_i32, %c0_i32_0 : i32, i32
  }
  func.func @transform_5(%arg0: i32, %arg1: i32) -> (i32, i32) {
    %c0_i32 = arith.constant 0 : i32
    %c0_i32_0 = arith.constant 0 : i32
    %c0_i32_1 = arith.constant 0 : i32
    return %c0_i32, %c0_i32_0 : i32, i32
  }
  func.func @transform_6(%arg0: i32, %arg1: i32) -> (i32, i32) {
    %c0_i32 = arith.constant 0 : i32
    %c0_i32_0 = arith.constant 0 : i32
    %c0_i32_1 = arith.constant 0 : i32
    return %c0_i32, %c0_i32_0 : i32, i32
  }
  func.func @transform_7(%arg0: i32, %arg1: i32) -> (i32, i32) {
    %c0_i32 = arith.constant 0 : i32
    %c0_i32_0 = arith.constant 0 : i32
    %c0_i32_1 = arith.constant 0 : i32
    return %c0_i32, %c0_i32_0 : i32, i32
  }
  func.func @transform_8(%arg0: i32, %arg1: i32) -> (i32, i32) {
    %c0_i32 = arith.constant 0 : i32
    %c0_i32_0 = arith.constant 0 : i32
    %c0_i32_1 = arith.constant 0 : i32
    return %c0_i32, %c0_i32_0 : i32, i32
  }
  func.func @transform_9(%arg0: i32, %arg1: i32) -> (i32, i32) {
    %c0_i32 = arith.constant 0 : i32
    %c0_i32_0 = arith.constant 0 : i32
    %c0_i32_1 = arith.constant 0 : i32
    return %c0_i32, %c0_i32_0 : i32, i32
  }
  func.func @transform_10(%arg0: i32, %arg1: i32) -> (i32, i32) {
    %c0_i32 = arith.constant 0 : i32
    %c0_i32_0 = arith.constant 0 : i32
    %c0_i32_1 = arith.constant 0 : i32
    return %c0_i32, %c0_i32_0 : i32, i32
  }
  func.func @transform_11(%arg0: i32, %arg1: i32) -> (i32, i32) {
    %c0_i32 = arith.constant 0 : i32
    %c0_i32_0 = arith.constant 0 : i32
    %c0_i32_1 = arith.constant 0 : i32
    return %c0_i32, %c0_i32_0 : i32, i32
  }
  func.func @transform_12(%arg0: i32, %arg1: i32) -> (i32, i32) {
    %c0_i32 = arith.constant 0 : i32
    %c0_i32_0 = arith.constant 0 : i32
    %c0_i32_1 = arith.constant 0 : i32
    return %c0_i32, %c0_i32_0 : i32, i32
  }
  func.func @transform_13(%arg0: i32, %arg1: i32) -> (i32, i32) {
    %c0_i32 = arith.constant 0 : i32
    %c0_i32_0 = arith.constant 0 : i32
    %c0_i32_1 = arith.constant 0 : i32
    return %c0_i32, %c0_i32_0 : i32, i32
  }
  func.func @transform_14(%arg0: i32, %arg1: i32) -> (i32, i32) {
    %c0_i32 = arith.constant 0 : i32
    %c0_i32_0 = arith.constant 0 : i32
    %c0_i32_1 = arith.constant 0 : i32
    return %c0_i32, %c0_i32_0 : i32, i32
  }
  func.func @transform_15(%arg0: i32, %arg1: i32) -> (i32, i32) {
    %c0_i32 = arith.constant 0 : i32
    %c0_i32_0 = arith.constant 0 : i32
    %c0_i32_1 = arith.constant 0 : i32
    return %c0_i32, %c0_i32_0 : i32, i32
  }
  func.func @transform_16(%arg0: i32, %arg1: i32) -> (i32, i32) {
    %c0_i32 = arith.constant 0 : i32
    %c0_i32_0 = arith.constant 0 : i32
    %c0_i32_1 = arith.constant 0 : i32
    return %c0_i32, %c0_i32_0 : i32, i32
  }
  func.func @transform_17(%arg0: i32, %arg1: i32) -> (i32, i32, i32) {
    %c0_i32 = arith.constant 0 : i32
    %c0_i32_0 = arith.constant 0 : i32
    return %arg0, %c0_i32, %arg1 : i32, i32, i32
  }
}

</mosaic_0001>

<bundles_post_ra>
// kernel: tpu_custom_call.1
= control target key start
LH: loop header
LB: loop body
LE: loop exit
PB: predicated region body
PF: predicated region fallthrough
CT: control target
= control target key end

     0   :  { %s1831_s24 = smov 0   ;;  %s1833_s25 = smov 0   ;;  %s2113_s0 = inlined_call_operand.vmem [shape: f32[2,3,256], index: 0, kind: input, shape index: {}]   ;;  %s2114_s1 = inlined_call_operand.vmem [shape: f32[2,35,1], index: 1, kind: input, shape index: {}]   ;;  %s2115_s2 = inlined_call_operand.vmem [shape: f32[2,35,1], index: 2, kind: input, shape index: {}]   ;;  %s2116_s3 = inlined_call_operand.vmem [shape: f32[35,3], index: 3, kind: input, shape index: {}]   ;;  %s2117_s4 = inlined_call_operand.vmem [shape: bf16[17,35], index: 4, kind: input, shape index: {}]   ;;  %s2118_s5 = inlined_call_operand.vmem [shape: f32[17,1], index: 5, kind: input, shape index: {}]   ;;  %s2119_s6 = inlined_call_operand.vmem [shape: bf16[8,17], index: 6, kind: input, shape index: {}]   ;;  %s2120_s7 = inlined_call_operand.vmem [shape: f32[8,1], index: 7, kind: input, shape index: {}]   ;;  %s2121_s8 = inlined_call_operand.vmem [shape: bf16[3,8], index: 8, kind: input, shape index: {}]   ;;  %s2122_s9 = inlined_call_operand.vmem [shape: f32[3,1], index: 9, kind: input, shape index: {}]   ;;  %s2123_s10 = inlined_call_operand.vmem [shape: f32[35,3], index: 10, kind: input, shape index: {}]   ;;  %s2124_s11 = inlined_call_operand.vmem [shape: bf16[17,35], index: 11, kind: input, shape index: {}]   ;;  %s2125_s12 = inlined_call_operand.vmem [shape: f32[17,1], index: 12, kind: input, shape index: {}]   ;;  %s2126_s13 = inlined_call_operand.vmem [shape: bf16[8,17], index: 13, kind: input, shape index: {}]   ;;  %s2127_s14 = inlined_call_operand.vmem [shape: f32[8,1], index: 14, kind: input, shape index: {}]   ;;  %s2128_s15 = inlined_call_operand.vmem [shape: bf16[3,8], index: 15, kind: input, shape index: {}]   ;;  %s2129_s16 = inlined_call_operand.vmem [shape: f32[3,1], index: 16, kind: input, shape index: {}]   ;;  %s2130_s17 = inlined_call_operand.vmem [shape: f32[2,3,256], index: 17, kind: output, shape index: {}]  }
   0x1   :  { %2131 = sst [smem:[#allocation2_spill]] %s2113_s0  ;;  %s1835_s26 = smov 0  }
   0x2   :  { %2132 = sst [smem:[#allocation3_spill]] %s2114_s1 }
   0x3 LB: > { %s39_s27 = sadd.s32 1, %s1731_s25  ;;  %p1631_p0 = scmp.ge.s32.totalorder %s1735_s26, 1  ;;  %s1735_s26 = sphi %s1835_s26, %s27_s26   ;;  %s1731_s25 = sphi %s1833_s25, %s2136_s25   ;;  %s1727_s24 = sphi %s1831_s24, %s2135_s24  }
   0x4   : > { %p41_p1 = scmp.ge.s32.totalorder %s39_s27, 2  ;;  %p528_p2 = scmp.lt.s32.totalorder %s1735_s26, 3 }
   0x6   : > { %s2138_s27 = smov (%p41_p1, %s39_s27), 0  ;;  %p529_p3 = pnand %p1631_p0, %p528_p2 }
   0x7   : > { %p599_p4 = scmp.lt.s32.totalorder (!%p529_p3), %s1727_s24, 1  ;;  %s2133_s20 = sld [smem:[#allocation3_spill]] (!%p529_p3) }
   0x8   : > { %532 = sbr.rel (%p529_p3) target bundleno = 1476 (0x5c4), region = 88  ;;  %s2134_s28 = sld [smem:[#allocation2_spill]] (!%p529_p3) }
   0xd   : > { %v634_v0 = vld [vmem:[%s2116_s3 + $0x20] sm:$0x7]  ;;  %v1737_v1 = vmov 2   ;;  %v1738_v2 = vmov 0   ;;  %s2140_s24 = smov (!%p599_p4, %s1727_s24), 1  ;;  %v632_v3 = vld [vmem:[%s2116_s3 + $0x10] sm:$0xff]  ;;  %v666_v19 = vlaneseq }
   0xe   : > { %1686 = vset.pattern.permute.xlu1 %v1737_v1  ;;  %1685 = vset.pattern.permute.xlu0 %v1738_v2  ;;  %s1656_s18 = smul.u32 40, %s2140_s24  ;;  %v633_v5 = vld [vmem:[%s2116_s3 + $0x18] sm:$0xff]  ;;  %v630_v6 = vld [vmem:[%s2116_s3] sm:$0xff]  ;;  %v1739_v7 = vmov 1   ;;  %v631_v8 = vld [vmem:[%s2116_s3 + $0x8] sm:$0xff]  ;;  %vm897_vm0 = vcmask 1040384  }
   0xf   : > { %769 = vperm.xlu1 %1686, %v634_v0   ;;  %662 = vperm.xlu0 %1685, %v634_v0   ;;  %v864_v10 = vld [vmem:[%s2118_s5] sm:$0xff]  ;;  %v866_v16 = vld [vmem:[%s2118_s5 + $0x10] sm:$0x1]  ;;  %v865_v17 = vld [vmem:[%s2118_s5 + $0x8] sm:$0xff]  ;;  %v667_v22 = vshrl.u32 %v666_v19, 7  ;;  %vm898_vm1 = vcmask 1041408  }
  0x10   : > { %939 = vmatprep.mubr.bf16.mxu0 %v1738_v2  ;;  %1019 = vmatprep.mubr.bf16.mxu1 %v1738_v2  ;;  %s1868_s21 = scalar_lea.vmem %s2133_s20, %s1656_s18  ;;  %v969_v11 = vld [vmem:[%s2120_s7] sm:$0xff]  ;;  %v1740_v62 = vmov 65535   ;;  %vm890_vm2 = vcmask 285696   ;;  %vm975_vm3 = vcmask 138240   ;;  %s2007_s1 = scalar_lea.vmem %s2115_s2, %s1656_s18  ;;  %vm1043_vm4 = vcmask 1043456  }
  0x11   : > { %v639_v4 = vld [vmem:[%s1868_s21 + $0x20] sm:$0x7]  ;;  %v637_v12 = vld [vmem:[%s1868_s21 + $0x10] sm:$0xff]  ;;  %v638_v14 = vld [vmem:[%s1868_s21 + $0x18] sm:$0xff]  ;;  %v1924_v23 = vsub.s32 0, %v667_v22  ;;  %v672_v24 = vsub.s32 4, %v667_v22 }
  0x12   : > { %v635_v9 = vld [vmem:[%s1868_s21] sm:$0xff]  ;;  %v636_v15 = vld [vmem:[%s1868_s21 + $0x8] sm:$0xff]  ;;  %s1654_s21 = sshll.u32 %s2140_s24, 3  ;;  %v1926_v25 = vsub.s32 1, %v667_v22  ;;  %v720_v26 = vsub.s32 5, %v667_v22  ;;  %v1928_v28 = vsub.s32 2, %v667_v22 }
  0x13   : > { %1687 = vset.pattern.permute.xlu1 %v1738_v2  ;;  %832 = vperm.xlu0 %1685, %v639_v4   ;;  %v1900_v13 = vld [vmem:[%s2123_s10 + $0x20] sm:$0x7]  ;;  %s606_s29 = scalar_lea.vmem %s2134_s28, %s1654_s21  ;;  %v778_v31 = vsub.s32 6, %v667_v22  ;;  %v899_v63 = vsel %vm897_vm0, 4294967295, %v1740_v62  ;;  %vm1039_vm5 = vcmask 64512   ;;  %s626_s0 = scalar_lea.vmem %s2130_s17, %s1654_s21 }
  0x14   : > { %652 = vperm.xlu1 %1687, %v632_v3   ;;  %v1033_v18 = vld [vmem:[%s2122_s9] sm:$0x7]  ;;  %v1952_v4 = vsel %vm898_vm1, %v899_v63, 0 }
  0x15   : > { %v629_v30 = vld [vmem:[%s606_s29] sm:$0x77] }
  0x16   : > { %v669_v32 = vrot.slane %v629_v30, %v1924_v23  ;;  %v673_v33 = vrot.slane %v629_v30, %v672_v24  ;;  %v717_v34 = vrot.slane %v629_v30, %v1926_v25  ;;  %v721_v35 = vrot.slane %v629_v30, %v720_v26 }
  0x17   : > { %642 = vperm.xlu0 %1685, %v630_v6   ;;  %v775_v37 = vrot.slane %v629_v30, %v1928_v28  ;;  %v779_v39 = vrot.slane %v629_v30, %v778_v31 }
  0x18   : > { %657 = vperm.xlu1 %1687, %v633_v5   ;;  %v1934_v40 = vrot.slane %v669_v32, %v1924_v23  ;;  %v1937_v41 = vrot.slane %v673_v33, %v1924_v23  ;;  %v727_v42 = vrot.slane %v717_v34, %v1926_v25  ;;  %v731_v43 = vrot.slane %v721_v35, %v1926_v25 }
  0x19   : > { %v1942_v44 = vrot.slane %v775_v37, %v1928_v28  ;;  %v1947_v48 = vrot.slane %v779_v39, %v1928_v28 }
  0x1b   : > { %1690 = vset.pattern.permute.xlu0 %v1739_v7 }
  0x1c   : > { %1688 = vset.pattern.permute.xlu1 %v1739_v7  ;;  %711 = vperm.xlu0 %1690, %v634_v0  }
  0x1d   : > { %707 = vperm.xlu1 %1688, %v633_v5  }
  0x20   : > { %703 = vperm.xlu0 %1690, %v632_v3  }
  0x21   : > { %1689 = vset.pattern.permute.xlu1 %v1737_v1 }
  0x22   : > { %761 = vperm.xlu1 %1689, %v632_v3  }
  0x24   : > { %695 = vperm.xlu0 %1690, %v630_v6  }
  0x26   : > { %765 = vperm.xlu1 %1689, %v633_v5  }
  0x28   : > { %1694 = vset.pattern.permute.xlu0 %v1737_v1 }
  0x29   : > { %757 = vperm.xlu0 %1694, %v631_v8  }
  0x2a   : > { %1691 = vset.pattern.permute.xlu1 %v1738_v2 }
  0x2b   : > { %647 = vperm.xlu1 %1691, %v631_v8  }
  0x2d   : > { %1696 = vset.pattern.permute.xlu0 %v1738_v2 }
  0x2e   : > { %812 = vperm.xlu0 %1696, %v635_v9  }
  0x2f   : > { %1692 = vset.pattern.permute.xlu1 %v1739_v7 }
  0x30   : > { %699 = vperm.xlu1 %1692, %v631_v8  }
  0x32   : > { %869 = vperm.xlu0 %1696, %v864_v10  }
  0x34   : > { %1693 = vset.pattern.permute.xlu1 %v1737_v1 }
  0x35   : > { %753 = vperm.xlu1 %1693, %v630_v6  }
  0x36   : > { %972 = vperm.xlu0 %1696, %v969_v11  }
  0x39   : > { %1695 = vset.pattern.permute.xlu1 %v1738_v2 }
  0x3a   : > { %822 = vperm.xlu1 %1695, %v637_v12   ;;  %1123 = vperm.xlu0 %1696, %v1900_v13  }
  0x3e   : > { %827 = vperm.xlu1 %1695, %v638_v14   ;;  %1699 = vset.pattern.permute.xlu0 %v1739_v7 }
  0x42   : > { %817 = vperm.xlu1 %1695, %v636_v15  }
  0x46   : > { %879 = vperm.xlu1 %1695, %v866_v16  }
  0x4a   : > { %874 = vperm.xlu1 %1695, %v865_v17  }
  0x4e   : > { %1036 = vperm.xlu1 %1695, %v1033_v18  }
  0x52   : > { %1697 = vset.pattern.permute.xlu1 %v1739_v7 }
  0x53   : > { %1161 = vperm.xlu1 %1697, %v1900_v13  }
  0x57   : > { %1698 = vset.pattern.permute.xlu1 %v1738_v2 }
  0x8a   : > { %v770_v20 = vpop.permute.xlu1 %769  ;;  %v663_v21 = vpop.permute.xlu0 %662 }
  0x8b   : > { %v692_v45 = vmul.f32 %v1934_v40, %v663_v21  ;;  %v693_v46 = vmul.f32 %v1937_v41, %v663_v21  ;;  %v798_v52 = vmul.f32 %v1942_v44, %v770_v20  ;;  %v799_v55 = vmul.f32 %v1947_v48, %v770_v20 }
  0x8e   : > { %v833_v29 = vpop.permute.xlu0 %832 }
  0x8f   : > { %v653_v27 = vpop.permute.xlu1 %652 }
  0x90   : > { %v688_v19 = vmul.f32 %v1934_v40, %v653_v27  ;;  %v689_v20 = vmul.f32 %v1937_v41, %v653_v27 }
  0x92   : > { %v643_v38 = vpop.permute.xlu0 %642 }
  0x93   : > { %v658_v36 = vpop.permute.xlu1 %657  ;;  %v684_v26 = vmul.f32 %v1934_v40, %v643_v38 }
  0x94   : > { %v690_v21 = vmul.f32 %v1934_v40, %v658_v36  ;;  %v691_v22 = vmul.f32 %v1937_v41, %v658_v36 }
  0x97   : > { %v712_v49 = vpop.permute.xlu0 %711 }
  0x98   : > { %v708_v47 = vpop.permute.xlu1 %707  ;;  %v740_v50 = vmul.f32 %v727_v42, %v712_v49  ;;  %v741_v51 = vmul.f32 %v731_v43, %v712_v49 }
  0x99   : > { %v738_v14 = vmul.f32 %v727_v42, %v708_v47  ;;  %v739_v15 = vmul.f32 %v731_v43, %v708_v47 }
  0x9a   : > { %v750_v53 = vadd.f32 %v740_v50, %v692_v45  ;;  %v751_v54 = vadd.f32 %v741_v51, %v693_v46 }
  0x9b   : > { %v704_v11 = vpop.permute.xlu0 %703  ;;  %v748_v32 = vadd.f32 %v738_v14, %v690_v21  ;;  %v749_v33 = vadd.f32 %v739_v15, %v691_v22 }
  0x9c   : > { %v808_v57 = vadd.f32 %v798_v52, %v750_v53  ;;  %v809_v58 = vadd.f32 %v799_v55, %v751_v54  ;;  %v736_v16 = vmul.f32 %v727_v42, %v704_v11  ;;  %v737_v17 = vmul.f32 %v731_v43, %v704_v11 }
  0x9d   : > { %v762_v56 = vpop.permute.xlu1 %761 }
  0x9e   : > { %v843_v59 = vadd.f32 %v833_v29, %v808_v57  ;;  %v844_v61 = vadd.f32 %v833_v29, %v809_v58  ;;  %v685_v29 = vmul.f32 %v1937_v41, %v643_v38  ;;  %v746_v34 = vadd.f32 %v736_v16, %v688_v19 }
  0x9f   : > { %v696_v18 = vpop.permute.xlu0 %695  ;;  %v747_v35 = vadd.f32 %v737_v17, %v689_v20  ;;  %v794_v36 = vmul.f32 %v1942_v44, %v762_v56  ;;  %v795_v47 = vmul.f32 %v1947_v48, %v762_v56 }
  0xa0   : > { %v854_v0 = vmax.f32 %v844_v61, 0.0  ;;  %v853_v3 = vmax.f32 %v843_v59, 0.0  ;;  %v732_v30 = vmul.f32 %v727_v42, %v696_v18  ;;  %v733_v31 = vmul.f32 %v731_v43, %v696_v18 }
  0xa1   : > { %v766_v60 = vpop.permute.xlu1 %765  ;;  %v804_v55 = vadd.f32 %v794_v36, %v746_v34  ;;  %v805_v57 = vadd.f32 %v795_v47, %v747_v35 }
  0xa2   : > { %v863_v5 = vpack.c.bf16 %v854_v0, %v854_v0  ;;  %v862_v6 = vpack.c.bf16 %v853_v3, %v853_v3  ;;  %v796_v49 = vmul.f32 %v1942_v44, %v766_v60  ;;  %v797_v38 = vmul.f32 %v1947_v48, %v766_v60 }
  0xa3   : > { %v742_v50 = vadd.f32 %v732_v30, %v684_v26  ;;  %v743_v51 = vadd.f32 %v733_v31, %v685_v29  ;;  %v1709_v29 = vld [vmem:[%s2117_s4] sm:$0xff]   ;;  %v1710_v30 = vld [vmem:[%s2117_s4 + $0x8] ss:$0 sps:$4 sm:$0x11]  }
  0xa4   : > { %v905_v9 = vand.u32 %v1952_v4, %v863_v5  ;;  %v902_v10 = vand.u32 %v1952_v4, %v862_v6  ;;  %v758_v45 = vpop.permute.xlu0 %757  ;;  %v806_v60 = vadd.f32 %v796_v49, %v748_v32  ;;  %v807_v0 = vadd.f32 %v797_v38, %v749_v33 }
  0xa5   : > { %v792_v53 = vmul.f32 %v1942_v44, %v758_v45  ;;  %v793_v54 = vmul.f32 %v1947_v48, %v758_v45 }
  0xa6   : > { %v648_v8 = vpop.permute.xlu1 %647  ;;  %917 = vmatprep.subr.bf16.mxu0 %v905_v9 }
  0xa7   : > { %918 = vmatpush1.bf16.msra.mxu0 %v902_v10  ;;  %v686_v52 = vmul.f32 %v1934_v40, %v648_v8 }
  0xa9   : > { %v813_v5 = vpop.permute.xlu0 %812 }
  0xab   : > { %v700_v12 = vpop.permute.xlu1 %699 }
  0xac   : > { %v734_v37 = vmul.f32 %v727_v42, %v700_v12  ;;  %v735_v39 = vmul.f32 %v731_v43, %v700_v12  ;;  %v687_v42 = vmul.f32 %v1937_v41, %v648_v8 }
  0xad   : > { %v870_v49 = vpop.permute.xlu0 %869 }
  0xae   : > { %v744_v58 = vadd.f32 %v734_v37, %v686_v52  ;;  %v745_v59 = vadd.f32 %v735_v39, %v687_v42 }
  0xb0   : > { %v754_v24 = vpop.permute.xlu1 %753  ;;  %v802_v9 = vadd.f32 %v792_v53, %v744_v58 }
  0xb1   : > { %v790_v27 = vmul.f32 %v1942_v44, %v754_v24  ;;  %v791_v46 = vmul.f32 %v1947_v48, %v754_v24  ;;  %v803_v44 = vadd.f32 %v793_v54, %v745_v59 }
  0xb3   : > { %v800_v56 = vadd.f32 %v790_v27, %v742_v50  ;;  %v801_v61 = vadd.f32 %v791_v46, %v743_v51 }
  0xb5   : > { %v823_v43 = vpop.permute.xlu1 %822  ;;  %v835_v41 = vadd.f32 %v813_v5, %v800_v56  ;;  %v836_v8 = vadd.f32 %v813_v5, %v801_v61  ;;  %v1094_v5 = vld [vmem:[%s2123_s10 + $0x18] sm:$0xff] }
  0xb6   : > { %v839_v62 = vadd.f32 %v823_v43, %v804_v55  ;;  %v840_v63 = vadd.f32 %v823_v43, %v805_v57  ;;  %v1984_v55 = vsel %vm897_vm0, 65535, %v1738_v2 }
  0xb7   : > { %v845_v19 = vmax.f32 %v835_v41, 0.0  ;;  %v846_v20 = vmax.f32 %v836_v8, 0.0  ;;  %v1099_v41 = vld [vmem:[%s2007_s1 + $0x18] sm:$0xff]  ;;  %v1296_v8 = vld [vmem:[%s2125_s12 + $0x10] sm:$0x1] }
  0xb8   : > { %v849_v10 = vmax.f32 %v839_v62, 0.0  ;;  %v850_v48 = vmax.f32 %v840_v63, 0.0 }
  0xb9   : > { %v828_v3 = vpop.permute.xlu1 %827 }
  0xba   : > { %v841_v40 = vadd.f32 %v828_v3, %v806_v60  ;;  %v842_v6 = vadd.f32 %v828_v3, %v807_v0  ;;  %v964_v0 = vld [vmem:[%s2119_s6] sm:$0xf]  ;;  %v1093_v3 = vld [vmem:[%s2123_s10 + $0x10] sm:$0xff] }
  0xbb   : > { %1113 = vperm.xlu1 %1698, %v1093_v3   ;;  %1153 = vperm.xlu0 %1699, %v1093_v3  }
  0xbc   : > { %v851_v11 = vmax.f32 %v841_v40, 0.0  ;;  %v852_v12 = vmax.f32 %v842_v6, 0.0  ;;  %v1100_v40 = vld [vmem:[%s2007_s1 + $0x20] sm:$0x7] }
  0xbd   : > { %v818_v14 = vpop.permute.xlu1 %817  ;;  %v1091_v6 = vld [vmem:[%s2123_s10] sm:$0xff] }
  0xbe   : > { %v837_v15 = vadd.f32 %v818_v14, %v802_v9  ;;  %v838_v16 = vadd.f32 %v818_v14, %v803_v44  ;;  %v861_v17 = vpack.c.bf16 %v852_v12, %v850_v48  ;;  %v860_v18 = vpack.c.bf16 %v851_v11, %v849_v10  ;;  %v1295_v9 = vld [vmem:[%s2125_s12 + $0x8] sm:$0xff]  ;;  %v1455_v44 = vld [vmem:[%s2129_s16] sm:$0x7]  ;;  %v1098_v10 = vld [vmem:[%s2007_s1 + $0x10] sm:$0xff] }
  0xbf   : > { %1118 = vperm.xlu1 %1698, %v1094_v5   ;;  %1700 = vset.pattern.permute.xlu0 %v1737_v1  ;;  %v1096_v48 = vld [vmem:[%s2007_s1] sm:$0xff]  ;;  %v1097_v11 = vld [vmem:[%s2007_s1 + $0x8] sm:$0xff] }
  0xc0   : > { %v847_v21 = vmax.f32 %v837_v15, 0.0  ;;  %v848_v22 = vmax.f32 %v838_v16, 0.0  ;;  %919 = vmatprep.subr.bf16.mxu0 %v861_v17  ;;  %1209 = vperm.xlu0 %1700, %v1900_v13   ;;  %v1092_v13 = vld [vmem:[%s2123_s10 + $0x8] sm:$0xff]  ;;  %v1394_v12 = vld [vmem:[%s2127_s14] sm:$0xff] }
  0xc1   : > { %920 = vmatpush1.bf16.msra.mxu0 %v860_v18  ;;  %v880_v33 = vpop.permute.xlu1 %879 }
  0xc2   : > { %v859_v24 = vpack.c.bf16 %v848_v22, %v846_v20  ;;  %v858_v26 = vpack.c.bf16 %v847_v21, %v845_v19 }
  0xc3   : > { %1701 = vset.pattern.permute.xlu1 %v1739_v7 }
  0xc4   : > { %921 = vmatprep.subr.bf16.mxu0 %v859_v24  ;;  %1157 = vperm.xlu1 %1701, %v1094_v5  }
  0xc5   : > { %922 = vmatpush1.bf16.msra.mxu0 %v858_v26  ;;  %v875_v45 = vpop.permute.xlu1 %874  ;;  %1201 = vperm.xlu0 %1700, %v1093_v3  }
  0xc8   : > { %1640 = vmatmul.mubr.msk.bf16.vlgmr.msra.gmra.mxu0 %vm890_vm2, %v1709_v29  ;;  %1702 = vset.pattern.permute.xlu1 %v1738_v2  ;;  %v1030_v29 = vld [vmem:[%s2121_s8] sm:$0x3] }
  0xc9   : > { %949 = vmatprep.mubr.bf16.mxu0 %v1738_v2  ;;  %1193 = vperm.xlu0 %1700, %v1091_v6  }
  0xca   : > { %1262 = vperm.xlu1 %1702, %v1100_v40  }
  0xcd   : > { %1706 = vset.pattern.permute.xlu0 %v1738_v2 }
  0xce   : > { %1703 = vset.pattern.permute.xlu1 %v1737_v1  ;;  %1108 = vperm.xlu0 %1706, %v1092_v13  }
  0xcf   : > { %1205 = vperm.xlu1 %1703, %v1094_v5  }
  0xd0   : > { %1641 = vmatmul.mubr.msk.bf16.gmra.mxu0 %vm890_vm2, %v1710_v30  ;;  %v1037_v30 = vpop.permute.xlu1 %1036 }
  0xd1   : > { %1364 = vmatprep.mubr.bf16.mxu0 %v1738_v2 }
  0xd2   : > { %1257 = vperm.xlu0 %1706, %v1099_v41  }
  0xd3   : > { %1704 = vset.pattern.permute.xlu1 %v1738_v2 }
  0xd4   : > { %1103 = vperm.xlu1 %1704, %v1091_v6  }
  0xd6   : > { %1309 = vperm.xlu0 %1706, %v1296_v8  }
  0xd8   : > { %1705 = vset.pattern.permute.xlu1 %v1739_v7  ;;  %v1294_v7 = vld [vmem:[%s2125_s12] sm:$0xff] }
  0xd9   : > { %1145 = vperm.xlu1 %1705, %v1091_v6  }
  0xda   : > { %1304 = vperm.xlu0 %1706, %v1295_v9  }
  0xdd   : > { %1149 = vperm.xlu1 %1705, %v1092_v13  }
  0xde   : > { %1458 = vperm.xlu0 %1706, %v1455_v44  }
  0xe1   : > { %1707 = vset.pattern.permute.xlu1 %v1737_v1  ;;  %v973_v1 = vpop.permute.xlu0 %972 }
  0xe2   : > { %1197 = vperm.xlu1 %1707, %v1092_v13  }
  0xe6   : > { %1708 = vset.pattern.permute.xlu1 %v1738_v2 }
  0xe7   : > { %1252 = vperm.xlu1 %1708, %v1098_v10  }
  0xeb   : > { %1242 = vperm.xlu1 %1708, %v1096_v48  }
  0xef   : > { %1247 = vperm.xlu1 %1708, %v1097_v11  }
  0xf3   : > { %1299 = vperm.xlu1 %1708, %v1294_v7  }
  0xf7   : > { %1397 = vperm.xlu1 %1708, %v1394_v12  }
 0x188   : > { %v941_v31 = vpop.f32.mrf.mxu0 }
 0x189   : > { %v942_v57 = vadd.f32 %v941_v31, %v870_v49  ;;  %v1162_v31 = vpop.permute.xlu1 %1161 }
 0x18a   : > { %v943_v32 = vpop.f32.mrf.mxu0 }
 0x18b   : > { %v944_v50 = vadd.f32 %v943_v32, %v870_v49  ;;  %v958_v63 = vmax.f32 %v942_v57, 0.0 }
 0x18c   : > { %v945_v34 = vpop.f32.mrf.mxu0 }
 0x18d   : > { %v946_v52 = vadd.f32 %v945_v34, %v875_v45  ;;  %v959_v58 = vmax.f32 %v944_v50, 0.0  ;;  %v1114_v32 = vpop.permute.xlu1 %1113 }
 0x18e   : > { %v947_v35 = vpop.f32.mrf.mxu0 }
 0x18f   : > { %v948_v46 = vadd.f32 %v947_v35, %v875_v45  ;;  %v960_v56 = vmax.f32 %v946_v52, 0.0 }
 0x190   : > { %v951_v37 = vpop.f32.mrf.mxu0 }
 0x191   : > { %v952_v39 = vadd.f32 %v951_v37, %v880_v33  ;;  %v961_v53 = vmax.f32 %v948_v46, 0.0  ;;  %v965_v60 = vpack.c.bf16 %v960_v56, %v958_v63 }
 0x192   : > { %v953_v27 = vpop.f32.mrf.mxu0 }
 0x193   : > { %v962_v36 = vmax.f32 %v952_v39, 0.0  ;;  %v954_v47 = vadd.f32 %v953_v27, %v880_v33  ;;  %v966_v62 = vpack.c.bf16 %v961_v53, %v959_v58  ;;  %v1119_v33 = vpop.permute.xlu1 %1118  ;;  %v1124_v39 = vpop.permute.xlu0 %1123 }
 0x194   : > { %v955_v38 = vpop.f32.mrf.mxu0 }
 0x195   : > { %v963_v51 = vmax.f32 %v954_v47, 0.0  ;;  %v967_v42 = vpack.c.bf16 %v962_v36, %v962_v36 }
 0x196   : > { %v956_v43 = vpop.f32.mrf.mxu0 }
 0x197   : > { %v968_v54 = vpack.c.bf16 %v963_v51, %v963_v51  ;;  %v982_v61 = vand.u32 %v1984_v55, %v967_v42  ;;  %v1158_v34 = vpop.permute.xlu1 %1157  ;;  %v1154_v45 = vpop.permute.xlu0 %1153 }
 0x199   : > { %v985_v59 = vand.u32 %v1984_v55, %v968_v54 }
 0x19b   : > { %999 = vmatprep.subr.bf16.mxu1 %v985_v59  ;;  %v2049_v35 = vpop.permute.xlu1 %1262  ;;  %v1210_v46 = vpop.permute.xlu0 %1209 }
 0x19c   : > { %1000 = vmatpush1.bf16.msra.mxu1 %v982_v61 }
 0x19d   : > { %1001 = vmatprep.subr.bf16.mxu1 %v966_v62 }
 0x19f   : > { %v2051_v37 = vpop.permute.xlu1 %1205  ;;  %v1202_v47 = vpop.permute.xlu0 %1201 }
 0x1a0   : > { %1002 = vmatpush1.bf16.msra.mxu1 %v965_v60 }
 0x1a3   : > { %1642 = vmatmul.mubr.msk.bf16.vlgmr.msra.gmra.mxu1 %vm975_vm3, %v964_v0  ;;  %v2053_v27 = vpop.permute.xlu1 %1103  ;;  %v2057_v52 = vpop.permute.xlu0 %1193 }
 0x1a4   : > { %1082 = vmatprep.mubr.bf16.mxu1 %v1738_v2 }
 0x1a7   : > { %v2055_v36 = vpop.permute.xlu1 %1145  ;;  %v1109_v40 = vpop.permute.xlu0 %1108 }
 0x1ab   : > { %v1150_v49 = vpop.permute.xlu1 %1149 }
 0x1af   : > { %v1198_v54 = vpop.permute.xlu1 %1197 }
 0x1b3   : > { %v1253_v13 = vpop.permute.xlu1 %1252 }
 0x263   : > { %v1021_v14 = vpop.f32.mrf.mxu1 }
 0x264   : > { %v1022_v15 = vadd.f32 %v1021_v14, %v973_v1 }
 0x265   : > { %v1023_v16 = vpop.f32.mrf.mxu1 }
 0x266   : > { %v1028_v17 = vmax.f32 %v1022_v15, 0.0  ;;  %v1024_v18 = vadd.f32 %v1023_v16, %v973_v1 }
 0x267   : > { %v1025_v19 = vpop.f32.mrf.mxu1 }
 0x268   : > { %v1031_v20 = vpack.c.bf16 %v1028_v17, %v1028_v17  ;;  %v1029_v21 = vmax.f32 %v1024_v18, 0.0 }
 0x269   : > { %v1026_v22 = vpop.f32.mrf.mxu1 }
 0x26a   : > { %v1032_v24 = vpack.c.bf16 %v1029_v21, %v1029_v21  ;;  %v1045_v26 = vsel %vm1043_vm4, %v1031_v20, 0 }
 0x26c   : > { %1643 = vmatprep.subr.msk.bf16.mxu1 %vm1043_vm4, %v1032_v24  ;;  %v1243_v24 = vpop.permute.xlu1 %1242 }
 0x26d   : > { %1065 = vmatpush1.bf16.msra.mxu1 %v1045_v26 }
 0x270   : > { %1644 = vmatmul.mubr.msk.bf16.vlgmr.msra.gmra.mxu1 %vm1039_vm5, %v1030_v29 }
 0x271   : > { %1441 = vmatprep.mubr.bf16.mxu1 %v1738_v2 }
 0x330   : > { %v1084_v38 = vpop.f32.mrf.mxu1 }
 0x331   : > { %v1085_v50 = vadd.f32 %v1084_v38, %v1037_v30 }
 0x332   : > { %v1086_v51 = vpop.f32.mrf.mxu1 }
 0x333   : > { %v1129_v42 = vrot.slane %v1085_v50, %v1924_v23  ;;  %v1167_v43 = vrot.slane %v1085_v50, %v1926_v25  ;;  %v1087_v53 = vadd.f32 %v1086_v51, %v1037_v30  ;;  %v1215_v56 = vrot.slane %v1085_v50, %v1928_v28 }
 0x334   : > { %v1088_v57 = vpop.f32.mrf.mxu1 }
 0x335   : > { %v1134_v58 = vmul.f32 %v1129_v42, %v2053_v27  ;;  %v1172_v59 = vmul.f32 %v1167_v43, %v2055_v36  ;;  %v1138_v61 = vmul.f32 %v1129_v42, %v1114_v32  ;;  %v1140_v62 = vmul.f32 %v1129_v42, %v1119_v33 }
 0x336   : > { %v1089_v63 = vpop.f32.mrf.mxu1  ;;  %v1176_v60 = vmul.f32 %v1167_v43, %v1154_v45  ;;  %v1178_v0 = vmul.f32 %v1167_v43, %v1158_v34  ;;  %v1133_v3 = vrot.slane %v1087_v53, %v1924_v23  ;;  %v1171_v5 = vrot.slane %v1087_v53, %v1926_v25 }
 0x337   : > { %v1182_v6 = vadd.f32 %v1172_v59, %v1134_v58  ;;  %v1219_v41 = vrot.slane %v1087_v53, %v1928_v28  ;;  %v1220_v44 = vmul.f32 %v1215_v56, %v2057_v52  ;;  %v1224_v7 = vmul.f32 %v1215_v56, %v1202_v47 }
 0x338   : > { %v1137_v8 = vmul.f32 %v1133_v3, %v1109_v40  ;;  %v1175_v9 = vmul.f32 %v1171_v5, %v1150_v49  ;;  %v1186_v10 = vadd.f32 %v1176_v60, %v1138_v61  ;;  %v1188_v48 = vadd.f32 %v1178_v0, %v1140_v62  ;;  %v1258_v61 = vpop.permute.xlu0 %1257  ;;  %v1248_v60 = vpop.permute.xlu1 %1247 }
 0x339   : > { %v1143_v11 = vmul.f32 %v1133_v3, %v1124_v39  ;;  %v1226_v12 = vmul.f32 %v1215_v56, %v2051_v37  ;;  %v1181_v1 = vmul.f32 %v1171_v5, %v1162_v31  ;;  %v1230_v14 = vadd.f32 %v1220_v44, %v1182_v6 }
 0x33a   : > { %v1136_v23 = vmul.f32 %v1129_v42, %v1109_v40  ;;  %v1174_v15 = vmul.f32 %v1167_v43, %v1150_v49  ;;  %v1142_v25 = vmul.f32 %v1129_v42, %v1124_v39  ;;  %v1185_v16 = vadd.f32 %v1175_v9, %v1137_v8 }
 0x33b   : > { %v1191_v17 = vadd.f32 %v1181_v1, %v1143_v11  ;;  %v1229_v18 = vmul.f32 %v1219_v41, %v1210_v46  ;;  %v1180_v19 = vmul.f32 %v1167_v43, %v1162_v31  ;;  %v1234_v28 = vadd.f32 %v1224_v7, %v1186_v10 }
 0x33c   : > { %v1236_v20 = vadd.f32 %v1226_v12, %v1188_v48  ;;  %v1223_v21 = vmul.f32 %v1219_v41, %v1198_v54  ;;  %v1139_v22 = vmul.f32 %v1133_v3, %v1114_v32  ;;  %v1228_v30 = vmul.f32 %v1215_v56, %v1210_v46 }
 0x33d   : > { %v1239_v26 = vadd.f32 %v1229_v18, %v1191_v17  ;;  %v1190_v29 = vadd.f32 %v1180_v19, %v1142_v25  ;;  %v1141_v38 = vmul.f32 %v1133_v3, %v1119_v33  ;;  %v1184_v50 = vadd.f32 %v1174_v15, %v1136_v23  ;;  %v1310_v19 = vpop.permute.xlu0 %1309 }
 0x33e   : > { %v1222_v51 = vmul.f32 %v1215_v56, %v1198_v54  ;;  %v1177_v53 = vmul.f32 %v1171_v5, %v1154_v45  ;;  %v1179_v57 = vmul.f32 %v1171_v5, %v1158_v34  ;;  %v1233_v58 = vadd.f32 %v1223_v21, %v1185_v16  ;;  %v1711_v16 = vld [vmem:[%s2124_s11] sm:$0xff]  }
 0x33f   : > { %v1274_v39 = vadd.f32 %v2049_v35, %v1239_v26  ;;  %v1238_v49 = vadd.f32 %v1228_v30, %v1190_v29  ;;  %v1225_v42 = vmul.f32 %v1219_v41, %v1202_v47  ;;  %v1227_v43 = vmul.f32 %v1219_v41, %v2051_v37 }
 0x340   : > { %v1187_v59 = vadd.f32 %v1177_v53, %v1139_v22  ;;  %v1189_v31 = vadd.f32 %v1179_v57, %v1141_v38  ;;  %v1135_v32 = vmul.f32 %v1133_v3, %v2053_v27  ;;  %v1269_v62 = vadd.f32 %v1253_v13, %v1234_v28 }
 0x341   : > { %v1284_v63 = vmax.f32 %v1274_v39, 0.0  ;;  %v1273_v33 = vadd.f32 %v2049_v35, %v1238_v49  ;;  %v1173_v46 = vmul.f32 %v1171_v5, %v2055_v36  ;;  %v1271_v45 = vadd.f32 %v1258_v61, %v1236_v20 }
 0x342   : > { %v1232_v34 = vadd.f32 %v1222_v51, %v1184_v50  ;;  %v1235_v54 = vadd.f32 %v1225_v42, %v1187_v59  ;;  %v1237_v56 = vadd.f32 %v1227_v43, %v1189_v31  ;;  %v1221_v6 = vmul.f32 %v1219_v41, %v2057_v52  ;;  %v1300_v50 = vpop.permute.xlu1 %1299 }
 0x343   : > { %v1293_v0 = vpack.c.bf16 %v1284_v63, %v1284_v63  ;;  %v1283_v47 = vmax.f32 %v1273_v33, 0.0  ;;  %v1183_v40 = vadd.f32 %v1173_v46, %v1135_v32  ;;  %v1268_v37 = vadd.f32 %v1248_v60, %v1233_v58 }
 0x344   : > { %v1270_v8 = vadd.f32 %v1253_v13, %v1235_v54  ;;  %v1272_v27 = vadd.f32 %v1258_v61, %v1237_v56  ;;  %v1265_v35 = vadd.f32 %v1243_v24, %v1230_v14  ;;  %v1279_v10 = vmax.f32 %v1269_v62, 0.0 }
 0x345   : > { %v1330_v3 = vand.u32 %v1293_v0, %v1952_v4  ;;  %v1292_v9 = vpack.c.bf16 %v1283_v47, %v1283_v47  ;;  %v1231_v44 = vadd.f32 %v1221_v6, %v1183_v40  ;;  %v1281_v48 = vmax.f32 %v1271_v45, 0.0  ;;  %v1389_v45 = vld [vmem:[%s2126_s13] sm:$0xf] }
 0x346   : > { %v1280_v36 = vmax.f32 %v1270_v8, 0.0  ;;  %v1282_v5 = vmax.f32 %v1272_v27, 0.0  ;;  %v1267_v11 = vadd.f32 %v1248_v60, %v1232_v34  ;;  %v1278_v1 = vmax.f32 %v1268_v37, 0.0  ;;  %v1398_v34 = vpop.permute.xlu1 %1397 }
 0x347   : > { %1342 = vmatprep.subr.bf16.mxu0 %v1330_v3  ;;  %v1327_v7 = vand.u32 %v1292_v9, %v1952_v4  ;;  %v1266_v12 = vadd.f32 %v1243_v24, %v1231_v44  ;;  %v1275_v13 = vmax.f32 %v1265_v35, 0.0  ;;  %v1290_v41 = vpack.c.bf16 %v1281_v48, %v1279_v10  ;;  %v1712_v4 = vld [vmem:[%s2124_s11 + $0x8] ss:$0 sps:$4 sm:$0x11]   ;;  %v1305_v24 = vpop.permute.xlu0 %1304 }
 0x348   : > { %v1291_v23 = vpack.c.bf16 %v1282_v5, %v1280_v36  ;;  %v1277_v15 = vmax.f32 %v1267_v11, 0.0 }
 0x349   : > { %1343 = vmatpush1.bf16.msra.mxu0 %v1327_v7  ;;  %v1276_v52 = vmax.f32 %v1266_v12, 0.0 }
 0x34a   : > { %1344 = vmatprep.subr.bf16.mxu0 %v1291_v23  ;;  %v1288_v14 = vpack.c.bf16 %v1277_v15, %v1275_v13 }
 0x34b   : > { %v1289_v25 = vpack.c.bf16 %v1278_v1, %v1276_v52  ;;  %v1459_v9 = vpop.permute.xlu0 %1458 }
 0x34d   : > { %1345 = vmatpush1.bf16.msra.mxu0 %v1290_v41 }
 0x34e   : > { %1346 = vmatprep.subr.bf16.mxu0 %v1289_v25 }
 0x351   : > { %1347 = vmatpush1.bf16.msra.mxu0 %v1288_v14 }
 0x354   : > { %1647 = vmatmul.mubr.msk.bf16.vlgmr.msra.gmra.mxu0 %vm890_vm2, %v1711_v16 }
 0x355   : > { %1374 = vmatprep.mubr.bf16.mxu0 %v1738_v2 }
 0x35c   : > { %1648 = vmatmul.mubr.msk.bf16.gmra.mxu0 %vm890_vm2, %v1712_v4 }
 0x414   : > { %v1366_v17 = vpop.f32.mrf.mxu0 }
 0x415   : > { %v1367_v31 = vadd.f32 %v1366_v17, %v1300_v50 }
 0x416   : > { %v1368_v18 = vpop.f32.mrf.mxu0 }
 0x417   : > { %v1369_v53 = vadd.f32 %v1368_v18, %v1300_v50  ;;  %v1383_v33 = vmax.f32 %v1367_v31, 0.0 }
 0x418   : > { %v1370_v28 = vpop.f32.mrf.mxu0 }
 0x419   : > { %v1371_v58 = vadd.f32 %v1370_v28, %v1305_v24  ;;  %v1384_v43 = vmax.f32 %v1369_v53, 0.0 }
 0x41a   : > { %v1372_v20 = vpop.f32.mrf.mxu0 }
 0x41b   : > { %v1373_v29 = vadd.f32 %v1372_v20, %v1305_v24  ;;  %v1385_v61 = vmax.f32 %v1371_v58, 0.0 }
 0x41c   : > { %v1376_v21 = vpop.f32.mrf.mxu0 }
 0x41d   : > { %v1377_v22 = vadd.f32 %v1376_v21, %v1310_v19  ;;  %v1386_v42 = vmax.f32 %v1373_v29, 0.0  ;;  %v1390_v46 = vpack.c.bf16 %v1385_v61, %v1383_v33 }
 0x41e   : > { %v1378_v26 = vpop.f32.mrf.mxu0 }
 0x41f   : > { %v1387_v30 = vmax.f32 %v1377_v22, 0.0  ;;  %v1379_v38 = vadd.f32 %v1378_v26, %v1310_v19  ;;  %v1391_v63 = vpack.c.bf16 %v1386_v42, %v1384_v43 }
 0x420   : > { %v1380_v51 = vpop.f32.mrf.mxu0 }
 0x421   : > { %v1388_v57 = vmax.f32 %v1379_v38, 0.0  ;;  %v1392_v39 = vpack.c.bf16 %v1387_v30, %v1387_v30 }
 0x422   : > { %v1381_v49 = vpop.f32.mrf.mxu0 }
 0x423   : > { %v1393_v59 = vpack.c.bf16 %v1388_v57, %v1388_v57  ;;  %v1404_v62 = vand.u32 %v1392_v39, %v1984_v55 }
 0x425   : > { %v1407_v32 = vand.u32 %v1393_v59, %v1984_v55 }
 0x427   : > { %1421 = vmatprep.subr.bf16.mxu1 %v1407_v32 }
 0x428   : > { %1422 = vmatpush1.bf16.msra.mxu1 %v1404_v62 }
 0x429   : > { %1423 = vmatprep.subr.bf16.mxu1 %v1391_v63 }
 0x42c   : > { %1424 = vmatpush1.bf16.msra.mxu1 %v1390_v46 }
 0x42f   : > { %1649 = vmatmul.mubr.msk.bf16.vlgmr.msra.gmra.mxu1 %vm975_vm3, %v1389_v45 }
 0x430   : > { %1502 = vmatprep.mubr.bf16.mxu1 %v1738_v2  ;;  %v1452_v2 = vld [vmem:[%s2128_s15] sm:$0x3] }
 0x4ef   : > { %v1443_v54 = vpop.f32.mrf.mxu1 }
 0x4f0   : > { %v1444_v56 = vadd.f32 %v1443_v54, %v1398_v34 }
 0x4f1   : > { %v1445_v60 = vpop.f32.mrf.mxu1 }
 0x4f2   : > { %v1450_v55 = vmax.f32 %v1444_v56, 0.0  ;;  %v1446_v0 = vadd.f32 %v1445_v60, %v1398_v34 }
 0x4f3   : > { %v1447_v47 = vpop.f32.mrf.mxu1 }
 0x4f4   : > { %v1453_v40 = vpack.c.bf16 %v1450_v55, %v1450_v55  ;;  %v1451_v6 = vmax.f32 %v1446_v0, 0.0 }
 0x4f5   : > { %v1448_v37 = vpop.f32.mrf.mxu1 }
 0x4f6   : > { %v1454_v8 = vpack.c.bf16 %v1451_v6, %v1451_v6  ;;  %v1465_v27 = vsel %vm1043_vm4, %v1453_v40, 0 }
 0x4f8   : > { %1650 = vmatprep.subr.msk.bf16.mxu1 %vm1043_vm4, %v1454_v8 }
 0x4f9   : > { %1485 = vmatpush1.bf16.msra.mxu1 %v1465_v27 }
 0x4fc   : > { %1651 = vmatmul.mubr.msk.bf16.vlgmr.msra.gmra.mxu1 %vm1039_vm5, %v1452_v2 }
 0x5bc   : > { %v1504_v3 = vpop.f32.mrf.mxu1 }
 0x5bd   : > { %v1505_v35 = vadd.f32 %v1504_v3, %v1459_v9 }
 0x5be   : > { %v1506_v44 = vpop.f32.mrf.mxu1 }
 0x5bf   : > { %v1507_v10 = vadd.f32 %v1506_v44, %v1459_v9 }
 0x5c0   : > { %v1508_v36 = vpop.f32.mrf.mxu1 }
 0x5c1   : > { %v1513_v5 = vcombine.low %v1505_v35, %v1507_v10 }
 0x5c2   : > { %v1509_v48 = vpop.f32.mrf.mxu1 }
 0x5c3   : > { %1515 = vst [vmem:[%s626_s0] sm:$0x77] %v1513_v5 }
 0x5c4 PF: > { %s27_s26 = sadd.s32 1, %s1735_s26   ;;  %s2135_s24 = smov %s1731_s25 }
 0x5c5   : > { %p24_p5 = scmp.ge.s32.totalorder %s27_s26, 4   ;;  %s2136_s25 = smov %s2138_s27 }
 0x5c7   :  { %26 = sbr.rel (!%p24_p5) target bundleno = 3 (0x3), region = 124 }

</bundles_post_ra>
